<compile_context>
chip_gen: v7x
topology: tpu7x:2x2x1
jax: 0.10.0
libtpu: 0.0.40
codegen_flags: <defaults>
</compile_context>

<pallas_src>
import math
from functools import partial

import jax
import jax.numpy as jnp
from jax.experimental import pallas as pl
from jax.experimental.pallas import tpu as pltpu


def _pe_kernel(seed_ref, x_ref, pe_ref, o_ref, *, p, training):
    # x_ref / o_ref block: (B, TILE);  pe_ref block: (1, TILE) -> broadcast add.
    y = x_ref[...] + pe_ref[...]
    if training and p > 0.0:
        # Distinct hardware-PRNG stream per grid tile.
        pltpu.prng_seed(seed_ref[0] + pl.program_id(0))
        bits = pltpu.prng_random_bits(y.shape)
        if bits.dtype != jnp.uint32:  # defensive: usually already uint32
            bits = pltpu.bitcast(bits, jnp.uint32)
        # Keep with probability (1 - p): uniform u32 >= p * 2^32 (clamped).
        thresh = jnp.uint32(min(int(p * 4294967296.0), 4294967295))
        keep = bits >= thresh
        scale = jnp.asarray(1.0 / (1.0 - p), dtype=y.dtype)
        y = jnp.where(keep, y * scale, jnp.zeros_like(y))
    o_ref[...] = y.astype(o_ref.dtype)


def make_pe_table(max_len, d_model, dtype=jnp.float32):
    """Deterministic sinusoidal table, identical math to the PyTorch __init__."""
    position = jnp.arange(max_len, dtype=jnp.float32)[:, None]            # (max_len, 1)
    div_term = jnp.exp(
        jnp.arange(0, d_model, 2, dtype=jnp.float32) * (-math.log(10000.0) / d_model)
    )                                                                      # (d_model//2,)
    ang = position * div_term                                              # (max_len, d//2)
    pe = jnp.zeros((max_len, d_model), jnp.float32)
    pe = pe.at[:, 0::2].set(jnp.sin(ang))
    pe = pe.at[:, 1::2].set(jnp.cos(ang))
    return pe.astype(dtype)


def _pick_tile(cols, n_rows, itemsize, target_block_bytes=4 << 20):
    """Lane-dense tile width (multiple of 128) sized for ~target padded VMEM bytes."""
    padded_rows = -(-n_rows // 8) * 8                    # sublane padding in VMEM
    max_tile = (target_block_bytes // (padded_rows * itemsize)) // 128 * 128
    max_tile = max(max_tile, 128)
    if cols <= max_tile:
        return cols                                      # single full-width block
    return max_tile


def positional_encoding(x, pe, *, p=0.1, training=False, seed=0):
    """dropout(x + pe[:S][None]) with x: [B, S, D]."""
    B, S, D = x.shape
    if training and p >= 1.0:                            # torch.nn.Dropout(p=1) -> zeros
        return jnp.zeros_like(x)

    cols = S * D
    x2 = x.reshape(B, cols)                              # lane-dense 2-D view
    pe2 = pe[:S, :].astype(x.dtype).reshape(1, cols)     # pe traffic in x's dtype
    tile = _pick_tile(cols, B, jnp.dtype(x.dtype).itemsize)
    grid = (pl.cdiv(cols, tile),)

    seed_arr = jnp.array([seed], dtype=jnp.int32)
    kernel = partial(_pe_kernel, p=float(p), training=bool(training))

    out2 = pl.pallas_call(
        kernel,
        out_shape=jax.ShapeDtypeStruct((B, cols), x.dtype),
        grid_spec=pltpu.PrefetchScalarGridSpec(
            num_scalar_prefetch=1,
            grid=grid,
            in_specs=[
                pl.BlockSpec((B, tile), lambda t, seed_ref: (0, t)),
                pl.BlockSpec((1, tile), lambda t, seed_ref: (0, t)),
            ],
            out_specs=pl.BlockSpec((B, tile), lambda t, seed_ref: (0, t)),
        ),
        compiler_params=pltpu.CompilerParams(
            dimension_semantics=("parallel",),
            vmem_limit_bytes=32 << 20,
        ),
    )(seed_arr, x2, pe2)
    return out2.reshape(B, S, D)


if __name__ == "__main__":
    B, S, D = 2, 8, 32
    MAX_LEN = 64

    key = jax.random.PRNGKey(0)
    x = jax.random.normal(key, (B, S, D), dtype=jnp.float32)
    pe = make_pe_table(MAX_LEN, D)

    # Eval-mode forward (dropout is the identity) — deterministic & checkable.
    out = jax.block_until_ready(positional_encoding(x, pe, p=0.1, training=False))

    ref = x + pe[:S, :][None, :, :]
    assert out.shape == (B, S, D)
    assert jnp.allclose(out, ref, atol=1e-6, rtol=1e-6)

    # The training/dropout path uses the TPU hardware PRNG
    # (pltpu.prng_seed / prng_random_bits), which only lowers on real TPU
    # hardware; it is intentionally not exercised here so this smoke test also
    # runs cleanly under CPU interpret mode.

    print("KERNEL_OK")
</pallas_src>

<mosaic_0001>
module attributes {stable_mosaic.version = 11 : i64} {
  func.func @_pe_kernel(%arg0: i32, %arg1: memref<1xi32, #tpu.memory_space<smem>>, %arg2: memref<2x256xf32, #tpu.memory_space<vmem>>, %arg3: memref<1x256xf32, #tpu.memory_space<vmem>>, %arg4: memref<2x256xf32, #tpu.memory_space<vmem>>) attributes {dimension_semantics = [#tpu.dimension_semantics<parallel>], iteration_bounds = array<i64: 1>, scalar_prefetch = 1 : i64, scratch_operands = 0 : i64, tpu.core_type = #tpu.core_type<tc>, window_params = [{transform_indices = @transform_0, window_bounds = array<i64: 2, 256>}, {transform_indices = @transform_1, window_bounds = array<i64: 1, 256>}, {transform_indices = @transform_2, window_bounds = array<i64: 2, 256>}]} {
    %c0 = arith.constant 0 : index
    %c0_0 = arith.constant 0 : index
    %0 = vector.load %arg2[%c0, %c0_0] : memref<2x256xf32, #tpu.memory_space<vmem>>, vector<2x256xf32>
    %c0_1 = arith.constant 0 : index
    %c0_2 = arith.constant 0 : index
    %1 = vector.load %arg3[%c0_1, %c0_2] : memref<1x256xf32, #tpu.memory_space<vmem>>, vector<1x256xf32>
    %2 = vector.broadcast %1 : vector<1x256xf32> to vector<2x256xf32>
    %3 = arith.addf %0, %2 : vector<2x256xf32>
    %c0_3 = arith.constant 0 : index
    %c0_4 = arith.constant 0 : index
    %4 = vector.load %arg4[%c0_3, %c0_4] : memref<2x256xf32, #tpu.memory_space<vmem>>, vector<2x256xf32>
    tpu.vector_store %arg4[%c0_3, %c0_4], %3 {strides = array<i32>} : memref<2x256xf32, #tpu.memory_space<vmem>>, vector<2x256xf32>,
    return
  }
  func.func @transform_0(%arg0: i32, %arg1: memref<1xi32, #tpu.memory_space<smem>>) -> (i32, i32) {
    %c0_i32 = arith.constant 0 : i32
    %c0_i32_0 = arith.constant 0 : i32
    return %c0_i32, %arg0 : i32, i32
  }
  func.func @transform_1(%arg0: i32, %arg1: memref<1xi32, #tpu.memory_space<smem>>) -> (i32, i32) {
    %c0_i32 = arith.constant 0 : i32
    %c0_i32_0 = arith.constant 0 : i32
    return %c0_i32, %arg0 : i32, i32
  }
  func.func @transform_2(%arg0: i32, %arg1: memref<1xi32, #tpu.memory_space<smem>>) -> (i32, i32) {
    %c0_i32 = arith.constant 0 : i32
    %c0_i32_0 = arith.constant 0 : i32
    return %c0_i32, %arg0 : i32, i32
  }
}

</mosaic_0001>

<bundles_post_ra>
// kernel: tpu_custom_call.1
= control target key start
LH: loop header
LB: loop body
LE: loop exit
PB: predicated region body
PF: predicated region fallthrough
CT: control target
= control target key end

     0   :  { %9 = vsyncpa [#allocation5], 0  ;;  %s164_s0 = inlined_call_operand.<no memory space> [shape: s32[1], index: 0, kind: input, shape index: {}]   ;;  %s165_s1 = inlined_call_operand.hbm [shape: f32[2,256], index: 1, kind: input, shape index: {}]   ;;  %s166_s2 = inlined_call_operand.vmem [shape: f32[1,256], index: 2, kind: input, shape index: {}]   ;;  %s167_s3 = inlined_call_operand.hbm [shape: f32[2,256], index: 3, kind: output, shape index: {}]  }
   0x1   :  { %10 = vsyncpa [#allocation6], 0  ;;  %s114_s12 = smov [#allocation4]   ;;  %s66_s16 = scalar_lea.hbm %s165_s1, 64 }
   0x2   :  { %s17_s13 = sshll.u32 %s114_s12, 4  ;;  %p67_p0 = scmp.ne.s32.totalorder %s165_s1, %s66_s16  ;;  %s18_s13 = int_to_ptr.vmem [resolvable:$true] %s17_s13 }
   0x3   :  { %p70_p1 = scmp.lt.u32.totalorder %s66_s16, %s165_s1 }
   0x5   :  { %p72_p2 = pnand %p70_p1, %p67_p0 }
   0x7   :  { %75 = shalt.err (!%p72_p2)
}
   0x8   :  { %s76_s20 = scalar_lea.vmem %s18_s13, 64  ;;  %p81_p4 = scmp.lt.s32.totalorder %s18_s13, %s18_s13 }
   0x9   :  { %p77_p3 = scmp.ne.s32.totalorder %s18_s13, %s76_s20  ;;  %p82_p5 = scmp.lt.s32.totalorder %s76_s20, %s76_s20 }
   0xb   :  { %p83_p6 = por %p82_p5, %p81_p4 }
   0xd   :  { %p84_p7 = pnand %p83_p6, %p77_p3 }
   0xf   :  { %87 = shalt.err (!%p84_p7)
}
  0x10   :  { %20 = dma.hbm_to_vmem [thread:$0]  %s165_s1, 64, %s18_s13, [#allocation5]  }
  0x11   :  { %110 = dma.done.wait [#allocation5], 64  }
  0x12   :  { %111 = vsyncadd [#allocation5], 4294967232  ;;  %v29_v0 = vlaneseq  ;;  %v115_v1 = vmov 1983009808   ;;  %v27_v7 = vld [vmem:[%s166_s2] sm:$0x3] }
  0x13   :  { %v39_v2 = vunpack.c.l.s4 %v115_v1  ;;  %v26_v12 = vld [vmem:[#allocation4] sm:$0xf]  ;;  %s116_s25 = smov [#allocation7]  }
  0x14   :  { %v30_v3 = vshrl.u32 %v29_v0, 7  ;;  %s54_s1 = sshll.u32 %s116_s25, 4  ;;  %s55_s1 = int_to_ptr.vmem [resolvable:$true] %s54_s1 }
  0x15   :  { %v40_v6 = vunpack.c.0.s8 %v39_v2  ;;  %s88_s26 = scalar_lea.vmem %s55_s1, 64  ;;  %p93_p9 = scmp.lt.s32.totalorder %s55_s1, %s55_s1 }
  0x16   :  { %v31_v4 = vsub.s32 0, %v30_v3  ;;  %v35_v5 = vsub.s32 1, %v30_v3  ;;  %p89_p8 = scmp.ne.s32.totalorder %s55_s1, %s88_s26  ;;  %p94_p10 = scmp.lt.s32.totalorder %s88_s26, %s88_s26 }
  0x17   :  { %v43_v10 = vsub.s32 %v40_v6, %v30_v3 }
  0x18   :  { %v32_v8 = vrot.slane %v27_v7, %v31_v4  ;;  %v36_v9 = vrot.slane %v27_v7, %v35_v5  ;;  %p95_p11 = por %p94_p10, %p93_p9 }
  0x1a   :  { %v37_v11 = vcombine.low %v32_v8, %v36_v9  ;;  %p96_p12 = pnand %p95_p11, %p89_p8 }
  0x1c   :  { %v44_v13 = vrot.slane %v37_v11, %v43_v10 }
  0x1e   :  { %v46_v14 = vadd.f32 %v44_v13, %v26_v12 }
  0x20   :  { %47 = vst [vmem:[#allocation7] sm:$0xf] %v46_v14 }
  0x21   :  { %99 = shalt.err (!%p96_p12)
}
  0x22   :  { %s100_s28 = scalar_lea.hbm %s167_s3, 64 }
  0x23   :  { %p101_p13 = scmp.ne.s32.totalorder %s167_s3, %s100_s28  ;;  %p104_p0 = scmp.lt.u32.totalorder %s100_s28, %s167_s3 }
  0x25   :  { %p106_p1 = pnand %p104_p0, %p101_p13 }
  0x27   :  { %109 = shalt.err (!%p106_p1)
}
  0x28   :  { %57 = dma.vmem_to_hbm [thread:$0]  %s55_s1, 64, %s167_s3, [#allocation6]  }
  0x29   :  { %112 = dma.done.wait [#allocation6], 64  }
  0x2a   :  { %113 = vsyncadd [#allocation6], 4294967232 }
  0x2b   :  { %61 = vsyncpa [#allocation5], 1 }
  0x2c   :  { %62 = vsyncpa [#allocation6], 1 }

</bundles_post_ra>
